<compile_context>
chip_gen: v6e
topology: v6e:2x2x1
jax: 0.10.0
libtpu: 0.0.40
codegen_flags: <defaults>
</compile_context>

<pallas_src>
from functools import partial

import jax
import jax.numpy as jnp
from jax import lax
from jax.experimental import pallas as pl
from jax.experimental.pallas import tpu as pltpu

# ----- Configuration (mirrors EntityAggrNet `options`) -----
OPTIONS = dict(
    n_layers=2,
    dims=(32, 32),          # in_channels == out_channels so output reshapes back to data.shape
    depth_size=8,
    depth_dim=16,
    depth_emb_pad=0,
    aggregation="add",      # GeneralConv aggr
    linearity=True,         # skip_linear -> lin_self is a Linear
    l2_normalize=True,
    edge_feature=True,
)

BN_EPS = 1e-5               # torch_geometric.nn.BatchNorm default eps
L2_EPS = 1e-12              # F.normalize default eps
D_PAD = 128                 # hidden dim padded to one full lane tile
X_PAD = 128                 # extra columns appended to A for the folded C / deg terms


def _round_up(x, m):
    return (x + m - 1) // m * m


def entity_aggr_kernel(x_ref, aaug_ref, wcat_ref, extras_ref, bs_ref, gamma_ref, beta_ref,
                       out_ref, *, n_layers: int, d_pad: int, n_real: int, l2_normalize: bool):
    """All GeneralConv + BatchNorm(batch stats) + ReLU layers fused, lane-padded to d_pad."""
    x = x_ref[...]           # [Np, Dp] f32 node features (pad rows / pad lanes are zero)
    a = aaug_ref[...]        # [Np, Np+X_PAD] bf16 augmented adjacency [A | C | deg | 0]
    inv_n = jnp.float32(1.0 / n_real)

    for l in range(n_layers):                     # static unroll over layers (weights are tiny)
        # One f32 MXU pass produces both projections: [lin_msg(x) | lin_self(x)].
        p = jnp.dot(x, wcat_ref[l], preferred_element_type=jnp.float32)   # [Np, 2*Dp]
        h = p[:, :d_pad].astype(jnp.bfloat16)     # lin_msg(x), bf16 for the big matmul
        s = p[:, d_pad:]                          # lin_self(x), stays f32

        # Folded 'add' aggregation in ONE bf16 MXU pass with f32 accumulation:
        #   A_aug @ [h ; embW ; bagg ; 0] == A@h + C@embW + deg*(bm+be)
        rhs = jnp.concatenate([h, extras_ref[l]], axis=0)                 # [Np+X_PAD, Dp] bf16
        out = jnp.dot(a, rhs, preferred_element_type=jnp.float32) + s + bs_ref[l]

        if l2_normalize:                          # F.normalize(out, p=2, dim=-1) via rsqrt (EUP)
            ss = jnp.sum(out * out, axis=-1, keepdims=True)
            out = out * lax.rsqrt(jnp.maximum(ss, L2_EPS * L2_EPS))

        # BatchNorm1d with batch (training-mode) statistics over the n_real real rows:
        # one-pass sum / sum-of-squares, then a folded per-channel scale & shift, then ReLU.
        o = out[:n_real]                          # static slice; identity when n_real == Np
        s1 = jnp.sum(o, axis=0, keepdims=True)
        s2 = jnp.sum(o * o, axis=0, keepdims=True)
        mean = s1 * inv_n
        var = jnp.maximum(s2 * inv_n - mean * mean, 0.0)
        scale = gamma_ref[l] * lax.rsqrt(var + BN_EPS)   # gamma pad lanes are zero -> pads stay 0
        shift = beta_ref[l] - mean * scale
        x = jnp.maximum(out * scale + shift, 0.0)

    out_ref[...] = x                              # lane-dense [Np, Dp] store


def _pad2(w, rows, cols):
    """Zero-pad a 2-D array up to (rows, cols). Padding is an exact no-op for the model."""
    return jnp.zeros((rows, cols), jnp.float32).at[:w.shape[0], :w.shape[1]].set(
        w.astype(jnp.float32))


def prepare_kernel_params(params, options, d_pad=D_PAD):
    """Host-side constant folding: pad to full lanes, fuse wm|ws, fold emb@we and bm+be."""
    ds = options["depth_size"]
    wcat, extras, bs, gamma, beta = [], [], [], [], []
    for layer in params["layers"]:
        wm_p = _pad2(layer["wm"], d_pad, d_pad)
        ws_p = _pad2(layer["ws"], d_pad, d_pad)
        wcat.append(jnp.concatenate([wm_p, ws_p], axis=1))                 # [Dp, 2*Dp] f32
        # extras rows 0..ds-1 = emb @ we (lin_edge folded), row ds = bm + be (message biases).
        embw = params["emb"] @ layer["we"]                                  # [ds, d_out]
        ex = jnp.zeros((X_PAD, d_pad), jnp.float32)
        ex = ex.at[:ds, :embw.shape[1]].set(embw)
        ex = ex.at[ds:ds + 1, :layer["bm"].shape[1]].set(layer["bm"] + layer["be"])
        extras.append(ex.astype(jnp.bfloat16))                             # bf16 RHS tail
        bs.append(_pad2(layer["bs"], 1, d_pad))
        # INVARIANT: gamma/beta/bs pad lanes must stay zero so cols D..127 remain exactly
        # zero through BN/ReLU and never leak into the next layer's L2 denominator.
        gamma.append(_pad2(layer["gamma"], 1, d_pad))
        beta.append(_pad2(layer["beta"], 1, d_pad))
    stack = lambda xs: jnp.stack(xs, axis=0)
    return dict(wcat=stack(wcat), extras=stack(extras), bs=stack(bs),
                gamma=stack(gamma), beta=stack(beta))


def entity_aggr_net_forward(inputs, params, options, d_pad=D_PAD):
    data = inputs["data"]                        # [B, T, D] latent data
    edges = inputs["edge"]                       # [2, E] int32 edge_index
    edge_feature_id = inputs["edge_feature"]     # [E] int32 edge feature ids
    B, T, D = data.shape
    N = B * T
    Np = _round_up(N, 16)                        # bf16 sublane packing for the stacked RHS
    ds = options["depth_size"]
    n_layers = options["n_layers"]

    # GNNDataTransform.debatch + lane/row padding (exact: pads are zero; pad rows are excluded
    # from the BatchNorm statistics inside the kernel and sliced off at the end).
    x = jnp.zeros((Np, d_pad), jnp.float32).at[:N, :D].set(
        data.reshape(N, D).astype(jnp.float32))

    # Augmented adjacency (flow='target_to_source', aggr='add'): messages are gathered from
    # edges[1] and summed at edges[0].
    #   cols [0, Np)      : A   edge multiplicities        (pairs with h rows of the RHS)
    #   cols [Np, Np+ds)  : C   per-node edge-feature counts (pairs with embW rows)
    #   col   Np+ds       : deg per-node #incoming messages  (pairs with the bagg row)
    a_aug = jnp.zeros((Np, Np + X_PAD), jnp.float32)
    a_aug = a_aug.at[edges[0], edges[1]].add(1.0)
    a_aug = a_aug.at[edges[0], Np + edge_feature_id].add(1.0)
    a_aug = a_aug.at[edges[0], Np + ds].add(1.0)
    a_aug = a_aug.astype(jnp.bfloat16)           # small integer counts -> exact in bf16

    kp = prepare_kernel_params(params, options, d_pad)

    # Size the scoped VMEM limit from the actual resident footprint, gated per generation.
    bytes_in_out = (x.size + Np * d_pad) * 4 + a_aug.size * 2
    bytes_w = (kp["wcat"].size * 4 + kp["extras"].size * 2
               + (kp["bs"].size + kp["gamma"].size + kp["beta"].size) * 4)
    bytes_tmp = Np * 2 * d_pad * 4 + (Np + X_PAD) * d_pad * 2 + 2 * Np * d_pad * 4
    footprint = bytes_in_out + bytes_w + bytes_tmp
    try:
        phys_vmem = int(pltpu.get_tpu_info().vmem_capacity_bytes)
    except Exception:
        phys_vmem = 64 << 20                     # conservative (v7x per-TC VMEM)
    assert footprint < phys_vmem, (
        "dense resident-A path exceeds VMEM; "
        "TODO(synk): tiled/streamed sparse-A path with cross-tile BN statistics")
    vmem_limit = int(min(phys_vmem, max(2 * footprint + (2 << 20), 16 << 20)))

    flops = n_layers * (2 * Np * (Np + X_PAD) * d_pad + 2 * Np * d_pad * (2 * d_pad))
    cost = pl.CostEstimate(flops=flops,
                           transcendentals=n_layers * (Np + d_pad),
                           bytes_accessed=bytes_in_out + bytes_w)

    kernel = partial(entity_aggr_kernel,
                     n_layers=n_layers, d_pad=d_pad, n_real=N,
                     l2_normalize=options["l2_normalize"])
    vmem = pl.BlockSpec(memory_space=pltpu.MemorySpace.VMEM)

    out = pl.pallas_call(
        kernel,
        out_shape=jax.ShapeDtypeStruct((Np, d_pad), jnp.float32),
        in_specs=[vmem] * 7,
        out_specs=vmem,
        compiler_params=pltpu.CompilerParams(vmem_limit_bytes=vmem_limit),
        cost_estimate=cost,
    )(x, a_aug, kp["wcat"], kp["extras"], kp["bs"], kp["gamma"], kp["beta"])

    return out[:N, :D].reshape(data.shape)


def init_params(key, options):
    d_in, d_out = options["dims"]
    depth_size, depth_dim = options["depth_size"], options["depth_dim"]
    keys = jax.random.split(key, 1 + options["n_layers"])
    emb = 0.1 * jax.random.normal(keys[0], (depth_size, depth_dim), jnp.float32)
    emb = emb.at[options["depth_emb_pad"]].set(0.0)          # padding_idx row is zero
    layers = []
    for i in range(options["n_layers"]):
        lk = jax.random.split(keys[1 + i], 6)
        layers.append(dict(
            wm=0.1 * jax.random.normal(lk[0], (d_in, d_out), jnp.float32),      # lin_msg.weight^T
            bm=0.01 * jax.random.normal(lk[1], (1, d_out), jnp.float32),        # lin_msg.bias
            we=0.1 * jax.random.normal(lk[2], (depth_dim, d_out), jnp.float32), # lin_edge.weight^T
            be=0.01 * jax.random.normal(lk[3], (1, d_out), jnp.float32),        # lin_edge.bias
            ws=0.1 * jax.random.normal(lk[4], (d_in, d_out), jnp.float32),      # lin_self.weight^T
            bs=0.01 * jax.random.normal(lk[5], (1, d_out), jnp.float32),        # lin_self.bias
            gamma=jnp.ones((1, d_out), jnp.float32),                            # BatchNorm weight
            beta=jnp.zeros((1, d_out), jnp.float32),                            # BatchNorm bias
        ))
    return dict(emb=emb, layers=layers)


if __name__ == "__main__":
    key = jax.random.PRNGKey(0)
    k_data, k_params = jax.random.split(key)

    B, T, D = 2, 8, 32                            # data: [batch, seq, hidden]
    data = jax.random.normal(k_data, (B, T, D), jnp.float32)

    # Edges between entity head words and subsequent words (flattened node ids in [0, B*T)).
    edges = jnp.array([
        [0, 0, 3, 8, 8, 8, 12, 12],    # edge_index[0]: aggregation targets (flow='target_to_source')
        [1, 2, 4, 9, 10, 11, 13, 14],  # edge_index[1]: message senders
    ], dtype=jnp.int32)
    E = edges.shape[1]
    edge_feature_id = jnp.array(
        [(i % (OPTIONS["depth_size"] - 1)) + 1 for i in range(E)], dtype=jnp.int32)

    params = init_params(k_params, OPTIONS)
    inputs = dict(data=data, edge=edges, edge_feature=edge_feature_id)

    out = entity_aggr_net_forward(inputs, params, OPTIONS)
    jax.block_until_ready(out)
    assert out.shape == data.shape and out.dtype == jnp.float32
    print("KERNEL_OK")
</pallas_src>

<mosaic_0001>
module attributes {stable_mosaic.version = 11 : i64} {
  func.func @entity_aggr_kernel(%arg0: memref<16x128xf32, #tpu.memory_space<vmem>>, %arg1: memref<16x144xbf16, #tpu.memory_space<vmem>>, %arg2: memref<2x128x256xf32, #tpu.memory_space<vmem>>, %arg3: memref<2x128x128xbf16, #tpu.memory_space<vmem>>, %arg4: memref<2x1x128xf32, #tpu.memory_space<vmem>>, %arg5: memref<2x1x128xf32, #tpu.memory_space<vmem>>, %arg6: memref<2x1x128xf32, #tpu.memory_space<vmem>>, %arg7: memref<16x128xf32, #tpu.memory_space<vmem>>) attributes {dimension_semantics = [], scalar_prefetch = 0 : i64, scratch_operands = 0 : i64, tpu.core_type = #tpu.core_type<tc>} {
    %c0 = arith.constant 0 : index
    %c0_0 = arith.constant 0 : index
    %0 = vector.load %arg0[%c0, %c0_0] : memref<16x128xf32, #tpu.memory_space<vmem>>, vector<16x128xf32>
    %c0_1 = arith.constant 0 : index
    %c0_2 = arith.constant 0 : index
    %1 = vector.load %arg1[%c0_1, %c0_2] : memref<16x144xbf16, #tpu.memory_space<vmem>>, vector<16x144xbf16>
    %c0_3 = arith.constant 0 : index
    %c0_4 = arith.constant 0 : index
    %c0_5 = arith.constant 0 : index
    %2 = vector.load %arg2[%c0_3, %c0_4, %c0_5] : memref<2x128x256xf32, #tpu.memory_space<vmem>>, vector<1x128x256xf32>
    %3 = vector.shape_cast %2 : vector<1x128x256xf32> to vector<128x256xf32>
    %cst = arith.constant dense<0.000000e+00> : vector<16x256xf32>
    %4 = tpu.matmul %0, %3, %cst {dimension_numbers = #tpu.dot_dimension_numbers<[1], [0], [0], [1], [0, 0, 1, 1], [], []>} : vector<16x128xf32>, vector<128x256xf32>, vector<16x256xf32> -> vector<16x256xf32>
    %5 = vector.extract_strided_slice %4 {offsets = [0, 0], sizes = [16, 128], strides = [1, 1]} : vector<16x256xf32> to vector<16x128xf32>
    %6 = arith.truncf %5 : vector<16x128xf32> to vector<16x128xbf16>
    %7 = vector.extract_strided_slice %4 {offsets = [0, 128], sizes = [16, 128], strides = [1, 1]} : vector<16x256xf32> to vector<16x128xf32>
    %c0_6 = arith.constant 0 : index
    %c0_7 = arith.constant 0 : index
    %c0_8 = arith.constant 0 : index
    %8 = vector.load %arg3[%c0_6, %c0_7, %c0_8] : memref<2x128x128xbf16, #tpu.memory_space<vmem>>, vector<1x128x128xbf16>
    %9 = vector.shape_cast %8 : vector<1x128x128xbf16> to vector<128x128xbf16>
    %10 = tpu.concatenate %6, %9 in 0 : vector<16x128xbf16>, vector<128x128xbf16> -> vector<144x128xbf16>
    %cst_9 = arith.constant dense<0.000000e+00> : vector<16x128xf32>
    %11 = tpu.matmul %1, %10, %cst_9 {dimension_numbers = #tpu.dot_dimension_numbers<[1], [0], [0], [1], [0, 0, 1, 1], [], []>} : vector<16x144xbf16>, vector<144x128xbf16>, vector<16x128xf32> -> vector<16x128xf32>
    %12 = arith.addf %11, %7 : vector<16x128xf32>
    %c0_10 = arith.constant 0 : index
    %c0_11 = arith.constant 0 : index
    %c0_12 = arith.constant 0 : index
    %13 = vector.load %arg4[%c0_10, %c0_11, %c0_12] : memref<2x1x128xf32, #tpu.memory_space<vmem>>, vector<1x1x128xf32>
    %14 = vector.shape_cast %13 : vector<1x1x128xf32> to vector<1x128xf32>
    %15 = vector.broadcast %14 : vector<1x128xf32> to vector<16x128xf32>
    %16 = arith.addf %12, %15 : vector<16x128xf32>
    %17 = arith.mulf %16, %16 : vector<16x128xf32>
    %cst_13 = arith.constant dense<0.000000e+00> : vector<16xf32>
    %18 = vector.multi_reduction <add>, %17, %cst_13 [1] : vector<16x128xf32> to vector<16xf32>
    %19 = vector.shape_cast %18 : vector<16xf32> to vector<16x1xf32>
    %cst_14 = arith.constant 1.000000e-24 : f32
    %20 = vector.broadcast %cst_14 : f32 to vector<16x1xf32>
    %21 = arith.maximumf %19, %20 : vector<16x1xf32>
    %22 = math.rsqrt %21 : vector<16x1xf32>
    %23 = vector.broadcast %22 : vector<16x1xf32> to vector<16x128xf32>
    %24 = arith.mulf %16, %23 : vector<16x128xf32>
    %cst_15 = arith.constant dense<0.000000e+00> : vector<128xf32>
    %25 = vector.multi_reduction <add>, %24, %cst_15 [0] : vector<16x128xf32> to vector<128xf32>
    %26 = vector.shape_cast %25 : vector<128xf32> to vector<1x128xf32>
    %27 = arith.mulf %24, %24 : vector<16x128xf32>
    %cst_16 = arith.constant dense<0.000000e+00> : vector<128xf32>
    %28 = vector.multi_reduction <add>, %27, %cst_16 [0] : vector<16x128xf32> to vector<128xf32>
    %29 = vector.shape_cast %28 : vector<128xf32> to vector<1x128xf32>
    %cst_17 = arith.constant 6.250000e-02 : f32
    %30 = vector.broadcast %cst_17 : f32 to vector<1x128xf32>
    %31 = arith.mulf %26, %30 : vector<1x128xf32>
    %cst_18 = arith.constant 6.250000e-02 : f32
    %32 = vector.broadcast %cst_18 : f32 to vector<1x128xf32>
    %33 = arith.mulf %29, %32 : vector<1x128xf32>
    %34 = arith.mulf %31, %31 : vector<1x128xf32>
    %35 = arith.subf %33, %34 : vector<1x128xf32>
    %cst_19 = arith.constant 0.000000e+00 : f32
    %36 = vector.broadcast %cst_19 : f32 to vector<1x128xf32>
    %37 = arith.maximumf %35, %36 : vector<1x128xf32>
    %c0_20 = arith.constant 0 : index
    %c0_21 = arith.constant 0 : index
    %c0_22 = arith.constant 0 : index
    %38 = vector.load %arg5[%c0_20, %c0_21, %c0_22] : memref<2x1x128xf32, #tpu.memory_space<vmem>>, vector<1x1x128xf32>
    %39 = vector.shape_cast %38 : vector<1x1x128xf32> to vector<1x128xf32>
    %cst_23 = arith.constant 9.99999974E-6 : f32
    %40 = vector.broadcast %cst_23 : f32 to vector<1x128xf32>
    %41 = arith.addf %37, %40 : vector<1x128xf32>
    %42 = math.rsqrt %41 : vector<1x128xf32>
    %43 = arith.mulf %39, %42 : vector<1x128xf32>
    %c0_24 = arith.constant 0 : index
    %c0_25 = arith.constant 0 : index
    %c0_26 = arith.constant 0 : index
    %44 = vector.load %arg6[%c0_24, %c0_25, %c0_26] : memref<2x1x128xf32, #tpu.memory_space<vmem>>, vector<1x1x128xf32>
    %45 = vector.shape_cast %44 : vector<1x1x128xf32> to vector<1x128xf32>
    %46 = arith.mulf %31, %43 : vector<1x128xf32>
    %47 = arith.subf %45, %46 : vector<1x128xf32>
    %48 = vector.broadcast %43 : vector<1x128xf32> to vector<16x128xf32>
    %49 = arith.mulf %24, %48 : vector<16x128xf32>
    %50 = vector.broadcast %47 : vector<1x128xf32> to vector<16x128xf32>
    %51 = arith.addf %49, %50 : vector<16x128xf32>
    %cst_27 = arith.constant 0.000000e+00 : f32
    %52 = vector.broadcast %cst_27 : f32 to vector<16x128xf32>
    %53 = arith.maximumf %51, %52 : vector<16x128xf32>
    %c1 = arith.constant 1 : index
    %c0_28 = arith.constant 0 : index
    %c0_29 = arith.constant 0 : index
    %54 = vector.load %arg2[%c1, %c0_28, %c0_29] : memref<2x128x256xf32, #tpu.memory_space<vmem>>, vector<1x128x256xf32>
    %55 = vector.shape_cast %54 : vector<1x128x256xf32> to vector<128x256xf32>
    %cst_30 = arith.constant dense<0.000000e+00> : vector<16x256xf32>
    %56 = tpu.matmul %53, %55, %cst_30 {dimension_numbers = #tpu.dot_dimension_numbers<[1], [0], [0], [1], [0, 0, 1, 1], [], []>} : vector<16x128xf32>, vector<128x256xf32>, vector<16x256xf32> -> vector<16x256xf32>
    %57 = vector.extract_strided_slice %56 {offsets = [0, 0], sizes = [16, 128], strides = [1, 1]} : vector<16x256xf32> to vector<16x128xf32>
    %58 = arith.truncf %57 : vector<16x128xf32> to vector<16x128xbf16>
    %59 = vector.extract_strided_slice %56 {offsets = [0, 128], sizes = [16, 128], strides = [1, 1]} : vector<16x256xf32> to vector<16x128xf32>
    %c1_31 = arith.constant 1 : index
    %c0_32 = arith.constant 0 : index
    %c0_33 = arith.constant 0 : index
    %60 = vector.load %arg3[%c1_31, %c0_32, %c0_33] : memref<2x128x128xbf16, #tpu.memory_space<vmem>>, vector<1x128x128xbf16>
    %61 = vector.shape_cast %60 : vector<1x128x128xbf16> to vector<128x128xbf16>
    %62 = tpu.concatenate %58, %61 in 0 : vector<16x128xbf16>, vector<128x128xbf16> -> vector<144x128xbf16>
    %cst_34 = arith.constant dense<0.000000e+00> : vector<16x128xf32>
    %63 = tpu.matmul %1, %62, %cst_34 {dimension_numbers = #tpu.dot_dimension_numbers<[1], [0], [0], [1], [0, 0, 1, 1], [], []>} : vector<16x144xbf16>, vector<144x128xbf16>, vector<16x128xf32> -> vector<16x128xf32>
    %64 = arith.addf %63, %59 : vector<16x128xf32>
    %c1_35 = arith.constant 1 : index
    %c0_36 = arith.constant 0 : index
    %c0_37 = arith.constant 0 : index
    %65 = vector.load %arg4[%c1_35, %c0_36, %c0_37] : memref<2x1x128xf32, #tpu.memory_space<vmem>>, vector<1x1x128xf32>
    %66 = vector.shape_cast %65 : vector<1x1x128xf32> to vector<1x128xf32>
    %67 = vector.broadcast %66 : vector<1x128xf32> to vector<16x128xf32>
    %68 = arith.addf %64, %67 : vector<16x128xf32>
    %69 = arith.mulf %68, %68 : vector<16x128xf32>
    %cst_38 = arith.constant dense<0.000000e+00> : vector<16xf32>
    %70 = vector.multi_reduction <add>, %69, %cst_38 [1] : vector<16x128xf32> to vector<16xf32>
    %71 = vector.shape_cast %70 : vector<16xf32> to vector<16x1xf32>
    %cst_39 = arith.constant 1.000000e-24 : f32
    %72 = vector.broadcast %cst_39 : f32 to vector<16x1xf32>
    %73 = arith.maximumf %71, %72 : vector<16x1xf32>
    %74 = math.rsqrt %73 : vector<16x1xf32>
    %75 = vector.broadcast %74 : vector<16x1xf32> to vector<16x128xf32>
    %76 = arith.mulf %68, %75 : vector<16x128xf32>
    %cst_40 = arith.constant dense<0.000000e+00> : vector<128xf32>
    %77 = vector.multi_reduction <add>, %76, %cst_40 [0] : vector<16x128xf32> to vector<128xf32>
    %78 = vector.shape_cast %77 : vector<128xf32> to vector<1x128xf32>
    %79 = arith.mulf %76, %76 : vector<16x128xf32>
    %cst_41 = arith.constant dense<0.000000e+00> : vector<128xf32>
    %80 = vector.multi_reduction <add>, %79, %cst_41 [0] : vector<16x128xf32> to vector<128xf32>
    %81 = vector.shape_cast %80 : vector<128xf32> to vector<1x128xf32>
    %cst_42 = arith.constant 6.250000e-02 : f32
    %82 = vector.broadcast %cst_42 : f32 to vector<1x128xf32>
    %83 = arith.mulf %78, %82 : vector<1x128xf32>
    %cst_43 = arith.constant 6.250000e-02 : f32
    %84 = vector.broadcast %cst_43 : f32 to vector<1x128xf32>
    %85 = arith.mulf %81, %84 : vector<1x128xf32>
    %86 = arith.mulf %83, %83 : vector<1x128xf32>
    %87 = arith.subf %85, %86 : vector<1x128xf32>
    %cst_44 = arith.constant 0.000000e+00 : f32
    %88 = vector.broadcast %cst_44 : f32 to vector<1x128xf32>
    %89 = arith.maximumf %87, %88 : vector<1x128xf32>
    %c1_45 = arith.constant 1 : index
    %c0_46 = arith.constant 0 : index
    %c0_47 = arith.constant 0 : index
    %90 = vector.load %arg5[%c1_45, %c0_46, %c0_47] : memref<2x1x128xf32, #tpu.memory_space<vmem>>, vector<1x1x128xf32>
    %91 = vector.shape_cast %90 : vector<1x1x128xf32> to vector<1x128xf32>
    %cst_48 = arith.constant 9.99999974E-6 : f32
    %92 = vector.broadcast %cst_48 : f32 to vector<1x128xf32>
    %93 = arith.addf %89, %92 : vector<1x128xf32>
    %94 = math.rsqrt %93 : vector<1x128xf32>
    %95 = arith.mulf %91, %94 : vector<1x128xf32>
    %c1_49 = arith.constant 1 : index
    %c0_50 = arith.constant 0 : index
    %c0_51 = arith.constant 0 : index
    %96 = vector.load %arg6[%c1_49, %c0_50, %c0_51] : memref<2x1x128xf32, #tpu.memory_space<vmem>>, vector<1x1x128xf32>
    %97 = vector.shape_cast %96 : vector<1x1x128xf32> to vector<1x128xf32>
    %98 = arith.mulf %83, %95 : vector<1x128xf32>
    %99 = arith.subf %97, %98 : vector<1x128xf32>
    %100 = vector.broadcast %95 : vector<1x128xf32> to vector<16x128xf32>
    %101 = arith.mulf %76, %100 : vector<16x128xf32>
    %102 = vector.broadcast %99 : vector<1x128xf32> to vector<16x128xf32>
    %103 = arith.addf %101, %102 : vector<16x128xf32>
    %cst_52 = arith.constant 0.000000e+00 : f32
    %104 = vector.broadcast %cst_52 : f32 to vector<16x128xf32>
    %105 = arith.maximumf %103, %104 : vector<16x128xf32>
    %c0_53 = arith.constant 0 : index
    %c0_54 = arith.constant 0 : index
    %106 = vector.load %arg7[%c0_53, %c0_54] : memref<16x128xf32, #tpu.memory_space<vmem>>, vector<16x128xf32>
    tpu.vector_store %arg7[%c0_53, %c0_54], %105 {strides = array<i32>} : memref<16x128xf32, #tpu.memory_space<vmem>>, vector<16x128xf32>,
    return
  }
}

</mosaic_0001>

<bundles_post_ra>
// kernel: tpu_custom_call.1
= control target key start
LH: loop header
LB: loop body
LE: loop exit
PB: predicated region body
PF: predicated region fallthrough
CT: control target
= control target key end

     0   :  { %12 = vsyncpa [#allocation3], 0  ;;  %s1004_s0 = inlined_call_operand.hbm [shape: f32[16,128], index: 0, kind: input, shape index: {}]   ;;  %s1005_s1 = inlined_call_operand.hbm [shape: bf16[16,144], index: 1, kind: input, shape index: {}]   ;;  %s1006_s2 = inlined_call_operand.hbm [shape: f32[2,128,256], index: 2, kind: input, shape index: {}]   ;;  %s1007_s3 = inlined_call_operand.hbm [shape: bf16[2,128,128], index: 3, kind: input, shape index: {}]   ;;  %s1008_s4 = inlined_call_operand.vmem [shape: f32[2,1,128], index: 4, kind: input, shape index: {}]   ;;  %s1009_s5 = inlined_call_operand.vmem [shape: f32[2,1,128], index: 5, kind: input, shape index: {}]   ;;  %s1010_s6 = inlined_call_operand.vmem [shape: f32[2,1,128], index: 6, kind: input, shape index: {}]   ;;  %s1011_s7 = inlined_call_operand.hbm [shape: f32[16,128], index: 7, kind: output, shape index: {}]  }
   0x1   :  { %13 = vsyncpa [#allocation6], 0 }
   0x2   :  { %14 = vsyncpa [#allocation9], 0 }
   0x3   :  { %15 = vsyncpa [#allocation4], 0  ;;  %s867_s24 = smov [#allocation5]   ;;  %s868_s26 = smov [#allocation2]  }
   0x4   :  { %s33_s25 = sshll.u32 %s867_s24, 4  ;;  %s21_s27 = sshll.u32 %s868_s26, 4  ;;  %s34_s25 = int_to_ptr.vmem [resolvable:$true] %s33_s25  ;;  %s22_s27 = int_to_ptr.vmem [resolvable:$true] %s21_s27 }
   0x5   :  { %s767_s28 = scalar_lea.vmem %s34_s25, 256  ;;  %p772_p1 = scmp.lt.s32.totalorder %s34_s25, %s34_s25 }
   0x6   :  { %p768_p0 = scmp.ne.s32.totalorder %s34_s25, %s767_s28  ;;  %p773_p2 = scmp.lt.s32.totalorder %s767_s28, %s767_s28 }
   0x8   :  { %p774_p3 = por %p773_p2, %p772_p1 }
   0xa   :  { %p775_p4 = pnand %p774_p3, %p768_p0 }
   0xc   :  { %778 = shalt.err (!%p775_p4)
}
   0xd   :  { %s869_s29 = smov 128   ;;  %s870_s30 = smov 8  }
   0xe   :  { %39 = dma.hbm_to_vmem [thread:$0]  %s1005_s1, 256, %s34_s25, [#allocation6], %s869_s29, %s869_s29, %s870_s30  }
   0xf   :  { %s787_s10 = scalar_lea.vmem %s22_s27, 256  ;;  %p792_p6 = scmp.lt.s32.totalorder %s22_s27, %s22_s27 }
  0x10   :  { %p788_p5 = scmp.ne.s32.totalorder %s22_s27, %s787_s10  ;;  %p793_p7 = scmp.lt.s32.totalorder %s787_s10, %s787_s10 }
  0x12   :  { %p794_p8 = por %p793_p7, %p792_p6 }
  0x14   :  { %p795_p9 = pnand %p794_p8, %p788_p5 }
  0x16   :  { %798 = shalt.err (!%p795_p9)
}
  0x17   :  { %27 = dma.hbm_to_vmem [thread:$0]  %s1004_s0, 256, %s22_s27, [#allocation3], %s869_s29, %s869_s29, %s870_s30  }
  0x18   :  { %s871_s13 = smov [#allocation7]  }
  0x19   :  { %s45_s14 = sshll.u32 %s871_s13, 4  ;;  %s46_s14 = int_to_ptr.vmem [resolvable:$true] %s45_s14 }
  0x1a   :  { %s807_s15 = scalar_lea.vmem %s46_s14, 8192  ;;  %p812_p11 = scmp.lt.s32.totalorder %s46_s14, %s46_s14 }
  0x1b   :  { %p808_p10 = scmp.ne.s32.totalorder %s46_s14, %s807_s15  ;;  %p813_p12 = scmp.lt.s32.totalorder %s807_s15, %s807_s15 }
  0x1d   :  { %p814_p13 = por %p813_p12, %p812_p11 }
  0x1f   :  { %p815_p0 = pnand %p814_p13, %p808_p10 }
  0x21   :  { %818 = shalt.err (!%p815_p0)
}
  0x22   :  { %s872_s1 = smov 256   ;;  %s873_s16 = smov 16  }
  0x23   :  { %51 = dma.hbm_to_vmem [thread:$0]  %s1006_s2, 8192, %s46_s14, [#allocation6], %s872_s1, %s872_s1, %s873_s16  }
  0x24   :  { %s874_s19 = smov [#allocation8]  }
  0x25   :  { %s57_s20 = sshll.u32 %s874_s19, 4  ;;  %s58_s20 = int_to_ptr.vmem [resolvable:$true] %s57_s20 }
  0x26   :  { %s827_s0 = scalar_lea.vmem %s58_s20, 2048  ;;  %p832_p2 = scmp.lt.s32.totalorder %s58_s20, %s58_s20 }
  0x27   :  { %p828_p1 = scmp.ne.s32.totalorder %s58_s20, %s827_s0  ;;  %p833_p3 = scmp.lt.s32.totalorder %s827_s0, %s827_s0 }
  0x29   :  { %p834_p4 = por %p833_p3, %p832_p2 }
  0x2b   :  { %p835_p5 = pnand %p834_p4, %p828_p1 }
  0x2d   :  { %838 = shalt.err (!%p835_p5)
}
  0x2e   :  { %s875_s21 = smov 64   ;;  %s876_s22 = smov 4  }
  0x2f   :  { %63 = dma.hbm_to_vmem [thread:$0]  %s1007_s3, 2048, %s58_s20, [#allocation9], %s875_s21, %s875_s21, %s876_s22  }
  0x30   :  { %859 = dma.done.wait [#allocation3], 256  }
  0x31   :  { %860 = vsyncadd [#allocation3], 4294967040 }
  0x32   :  { %861 = dma.done.wait [#allocation6], 8448  }
  0x33   :  { %862 = vsyncadd [#allocation6], 4294958848 }
  0x34   :  { %863 = dma.done.wait [#allocation9], 2048  }
  0x35   :  { %864 = vsyncadd [#allocation9], 4294965248  ;;  %v877_v0 = vmov 0.0   ;;  %v878_v1 = vmov 0   ;;  %v118_v2 = vld [vmem:[#allocation7 + $0xf8] sm:$0xff]  ;;  %v117_v3 = vld [vmem:[#allocation7 + $0xf0] sm:$0xff] }
  0x36   :  { %183 = vmatprep.mubr.f32.mxu0 %v877_v0  ;;  %274 = vmatprep.subr.bf16.mxu1 %v878_v1  ;;  %v116_v4 = vld [vmem:[#allocation7 + $0xe8] sm:$0xff]  ;;  %v115_v5 = vld [vmem:[#allocation7 + $0xe0] sm:$0xff]  ;;  %v114_v6 = vld [vmem:[#allocation7 + $0xd8] sm:$0xff]  ;;  %vm270_vm0 = vcmask 130048   ;;  %s879_s13 = smov [#allocation10]  }
  0x37   :  { %119 = vmatprep.subr.mxu0 %v118_v2  ;;  %v113_v7 = vld [vmem:[#allocation7 + $0xd0] sm:$0xff]  ;;  %v112_v8 = vld [vmem:[#allocation7 + $0xc8] sm:$0xff]  ;;  %v111_v9 = vld [vmem:[#allocation7 + $0xc0] sm:$0xff]  ;;  %s676_s14 = sshll.u32 %s879_s13, 4  ;;  %s677_s14 = int_to_ptr.vmem [resolvable:$true] %s676_s14 }
  0x38   :  { %120 = vmatpush1.msra.mxu0 %v117_v3  ;;  %v110_v10 = vld [vmem:[#allocation7 + $0xb8] sm:$0xff]  ;;  %v109_v11 = vld [vmem:[#allocation7 + $0xb0] sm:$0xff]  ;;  %v108_v12 = vld [vmem:[#allocation7 + $0xa8] sm:$0xff]  ;;  %p844_p7 = scmp.lt.s32.totalorder %s677_s14, %s677_s14 }
  0x39   :  { %121 = vmatprep.subr.mxu0 %v116_v4  ;;  %v107_v13 = vld [vmem:[#allocation7 + $0xa0] sm:$0xff]  ;;  %v106_v14 = vld [vmem:[#allocation7 + $0x98] sm:$0xff]  ;;  %v105_v15 = vld [vmem:[#allocation7 + $0x90] sm:$0xff] }
  0x3a   :  { %122 = vmatpush1.msra.mxu0 %v115_v5  ;;  %v104_v16 = vld [vmem:[#allocation7 + $0x88] sm:$0xff]  ;;  %v103_v17 = vld [vmem:[#allocation7 + $0x80] sm:$0xff]  ;;  %v102_v18 = vld [vmem:[#allocation7 + $0x78] sm:$0xff] }
  0x3b   :  { %123 = vmatprep.subr.mxu0 %v114_v6  ;;  %v728_v19 = vld [vmem:[#allocation8 + $0x30] sm:$0xff]   ;;  %v100_v21 = vld [vmem:[#allocation7 + $0x68] sm:$0xff]  ;;  %v99_v23 = vld [vmem:[#allocation7 + $0x60] sm:$0xff] }
  0x3c   :  { %124 = vmatpush1.msra.mxu0 %v113_v7  ;;  %v101_v20 = vld [vmem:[#allocation7 + $0x70] sm:$0xff]  ;;  %275 = vmatpush1.bf16.msra.mxu1 %v728_v19  ;;  %v729_v22 = vld [vmem:[#allocation8 + $0x28] sm:$0xff]   ;;  %v98_v24 = vld [vmem:[#allocation7 + $0x58] sm:$0xff] }
  0x3d   :  { %125 = vmatprep.subr.mxu0 %v112_v8  ;;  %276 = vmatprep.subr.bf16.mxu1 %v878_v1  ;;  %v97_v25 = vld [vmem:[#allocation7 + $0x50] sm:$0xff]  ;;  %v730_v26 = vld [vmem:[#allocation8 + $0x20] sm:$0xff]   ;;  %v96_v27 = vld [vmem:[#allocation7 + $0x48] sm:$0xff] }
  0x3e   :  { %126 = vmatpush1.msra.mxu0 %v111_v9  ;;  %v95_v28 = vld [vmem:[#allocation7 + $0x40] sm:$0xff]  ;;  %v94_v29 = vld [vmem:[#allocation7 + $0x38] sm:$0xff]  ;;  %v93_v31 = vld [vmem:[#allocation7 + $0x30] sm:$0xff] }
  0x3f   :  { %127 = vmatprep.subr.mxu0 %v110_v10  ;;  %v731_v30 = vld [vmem:[#allocation8 + $0x18] sm:$0xff]   ;;  %v92_v32 = vld [vmem:[#allocation7 + $0x28] sm:$0xff]  ;;  %v91_v33 = vld [vmem:[#allocation7 + $0x20] sm:$0xff] }
  0x40   :  { %128 = vmatpush1.msra.mxu0 %v109_v11  ;;  %277 = vmatpush1.bf16.msra.mxu1 %v729_v22  ;;  %v90_v34 = vld [vmem:[#allocation7 + $0x18] sm:$0xff]  ;;  %v732_v35 = vld [vmem:[#allocation8 + $0x10] sm:$0xff]   ;;  %v88_v37 = vld [vmem:[#allocation7 + $0x8] sm:$0xff] }
  0x41   :  { %129 = vmatprep.subr.mxu0 %v108_v12  ;;  %278 = vmatprep.subr.bf16.mxu1 %v878_v1  ;;  %v89_v36 = vld [vmem:[#allocation7 + $0x10] sm:$0xff]  ;;  %v87_v38 = vld [vmem:[#allocation7] sm:$0xff]  ;;  %v733_v40 = vld [vmem:[#allocation8 + $0x8] sm:$0xff]  }
  0x42   :  { %130 = vmatpush1.msra.mxu0 %v107_v13  ;;  %v83_v39 = vld [vmem:[#allocation2] sm:$0xff]  ;;  %v84_v41 = vld [vmem:[#allocation2 + $0x8] sm:$0xff]  ;;  %v738_v43 = vld [vmem:[#allocation5 + $0x4] ss:$8 sps:$4 sm:$0xff]  }
  0x43   :  { %131 = vmatprep.subr.mxu0 %v106_v14  ;;  %v734_v42 = vld [vmem:[#allocation8] sm:$0xff]   ;;  %700 = vmatprep.mubr.msk.bf16.mxu1 %vm270_vm0, %v738_v43  ;;  %v735_v48 = vld [vmem:[#allocation8 + $0x38] sm:$0xff]   ;;  %v413_v63 = vld [vmem:[#allocation7 + $0x1f0] sm:$0xff] }
  0x44   :  { %132 = vmatpush1.msra.mxu0 %v105_v15  ;;  %279 = vmatpush1.bf16.msra.mxu1 %v730_v26  ;;  %v950_v49 = vld [vmem:[#allocation5] ss:$8 sps:$4 sm:$0xff]   ;;  %v701_v51 = vld [vmem:[%s1008_s4] ss:$0 sm:$0xff]  ;;  %v412_v2 = vld [vmem:[#allocation7 + $0x1e8] sm:$0xff] }
  0x45   :  { %133 = vmatprep.subr.mxu0 %v104_v16  ;;  %280 = vmatprep.subr.bf16.mxu1 %v878_v1  ;;  %v414_v62 = vld [vmem:[#allocation7 + $0x1f8] sm:$0xff]  ;;  %v411_v3 = vld [vmem:[#allocation7 + $0x1e0] sm:$0xff]  ;;  %v409_v5 = vld [vmem:[#allocation7 + $0x1d0] sm:$0xff] }
  0x46   :  { %134 = vmatpush1.msra.mxu0 %v103_v17  ;;  %v410_v4 = vld [vmem:[#allocation7 + $0x1d8] sm:$0xff]  ;;  %v408_v6 = vld [vmem:[#allocation7 + $0x1c8] sm:$0xff]  ;;  %v407_v7 = vld [vmem:[#allocation7 + $0x1c0] sm:$0xff] }
  0x47   :  { %135 = vmatprep.subr.mxu0 %v102_v18  ;;  %v406_v8 = vld [vmem:[#allocation7 + $0x1b8] sm:$0xff]  ;;  %v405_v9 = vld [vmem:[#allocation7 + $0x1b0] sm:$0xff]  ;;  %v404_v10 = vld [vmem:[#allocation7 + $0x1a8] sm:$0xff] }
  0x48   :  { %136 = vmatpush1.msra.mxu0 %v101_v20  ;;  %281 = vmatpush1.bf16.msra.mxu1 %v731_v30  ;;  %v403_v11 = vld [vmem:[#allocation7 + $0x1a0] sm:$0xff]  ;;  %v402_v12 = vld [vmem:[#allocation7 + $0x198] sm:$0xff]  ;;  %v401_v13 = vld [vmem:[#allocation7 + $0x190] sm:$0xff] }
  0x49   :  { %137 = vmatprep.subr.mxu0 %v100_v21  ;;  %282 = vmatprep.subr.bf16.mxu1 %v878_v1  ;;  %v400_v14 = vld [vmem:[#allocation7 + $0x188] sm:$0xff]  ;;  %v399_v15 = vld [vmem:[#allocation7 + $0x180] sm:$0xff]  ;;  %v398_v16 = vld [vmem:[#allocation7 + $0x178] sm:$0xff] }
  0x4a   :  { %138 = vmatpush1.msra.mxu0 %v99_v23  ;;  %v397_v17 = vld [vmem:[#allocation7 + $0x170] sm:$0xff]  ;;  %v396_v18 = vld [vmem:[#allocation7 + $0x168] sm:$0xff]  ;;  %v395_v19 = vld [vmem:[#allocation7 + $0x160] sm:$0xff] }
  0x4b   :  { %139 = vmatprep.subr.mxu0 %v98_v24  ;;  %v394_v20 = vld [vmem:[#allocation7 + $0x158] sm:$0xff]  ;;  %v393_v21 = vld [vmem:[#allocation7 + $0x150] sm:$0xff]  ;;  %v392_v22 = vld [vmem:[#allocation7 + $0x148] sm:$0xff] }
  0x4c   :  { %140 = vmatpush1.msra.mxu0 %v97_v25  ;;  %283 = vmatpush1.bf16.msra.mxu1 %v732_v35  ;;  %v391_v23 = vld [vmem:[#allocation7 + $0x140] sm:$0xff]  ;;  %v390_v24 = vld [vmem:[#allocation7 + $0x138] sm:$0xff]  ;;  %v389_v25 = vld [vmem:[#allocation7 + $0x130] sm:$0xff] }
  0x4d   :  { %141 = vmatprep.subr.mxu0 %v96_v27  ;;  %284 = vmatprep.subr.bf16.mxu1 %v878_v1  ;;  %v388_v26 = vld [vmem:[#allocation7 + $0x128] sm:$0xff]  ;;  %v387_v27 = vld [vmem:[#allocation7 + $0x120] sm:$0xff]  ;;  %v742_v35 = vld [vmem:[#allocation8 + $0x58] sm:$0xff]  }
  0x4e   :  { %142 = vmatpush1.msra.mxu0 %v95_v28  ;;  %v386_v28 = vld [vmem:[#allocation7 + $0x118] sm:$0xff]  ;;  %v384_v30 = vld [vmem:[#allocation7 + $0x108] sm:$0xff] }
  0x4f   :  { %143 = vmatprep.subr.mxu0 %v94_v29  ;;  %v385_v29 = vld [vmem:[#allocation7 + $0x110] sm:$0xff] }
  0x50   :  { %144 = vmatpush1.msra.mxu0 %v93_v31  ;;  %285 = vmatpush1.bf16.msra.mxu1 %v733_v40  ;;  %v383_v31 = vld [vmem:[#allocation7 + $0x100] sm:$0xff] }
  0x51   :  { %145 = vmatprep.subr.mxu0 %v92_v32  ;;  %286 = vmatprep.subr.bf16.mxu1 %v878_v1  ;;  %v739_v32 = vld [vmem:[#allocation8 + $0x70] sm:$0xff]  }
  0x52   :  { %146 = vmatpush1.msra.mxu0 %v91_v33  ;;  %v740_v33 = vld [vmem:[#allocation8 + $0x68] sm:$0xff]  }
  0x53   :  { %147 = vmatprep.subr.mxu0 %v90_v34  ;;  %v741_v34 = vld [vmem:[#allocation8 + $0x60] sm:$0xff]  }
  0x54   :  { %148 = vmatpush1.msra.mxu0 %v89_v36  ;;  %287 = vmatpush1.bf16.msra.mxu1 %v734_v42  ;;  %v743_v36 = vld [vmem:[#allocation8 + $0x50] sm:$0xff]  }
  0x55   :  { %149 = vmatprep.subr.mxu0 %v88_v37  ;;  %288 = vmatprep.subr.bf16.mxu1 %v878_v1  ;;  %v744_v37 = vld [vmem:[#allocation8 + $0x48] sm:$0xff]  }
  0x56   :  { %150 = vmatpush1.msra.mxu0 %v87_v38 }
  0x57   :  { %184 = vmatmul.mubr.f32.vlgmr.msra.gmra.mxu0 %v83_v39  ;;  %415 = vmatprep.subr.mxu0 %v414_v62 }
  0x58   :  { %189 = vmatprep.mubr.f32.mxu0 %v877_v0  ;;  %416 = vmatpush1.msra.mxu0 %v413_v63 }
  0x59   :  { %417 = vmatprep.subr.mxu0 %v412_v2 }
  0x5a   :  { %418 = vmatpush1.msra.mxu0 %v411_v3 }
  0x5b   :  { %190 = vmatmul.mubr.f32.gmra.mxu0 %v84_v41  ;;  %419 = vmatprep.subr.mxu0 %v410_v4 }
  0x5c   :  { %479 = vmatprep.mubr.f32.mxu0 %v877_v0  ;;  %420 = vmatpush1.msra.mxu0 %v409_v5 }
  0x5d   :  { %421 = vmatprep.subr.mxu0 %v408_v6 }
  0x5e   :  { %422 = vmatpush1.msra.mxu0 %v407_v7  ;;  %v365_v7 = vlaneseq }
  0x5f   :  { %423 = vmatprep.subr.mxu0 %v406_v8 }
  0x60   :  { %424 = vmatpush1.msra.mxu0 %v405_v9  ;;  %v366_v8 = vshrl.u32 %v365_v7, 7  ;;  %v357_v9 = vld [vmem:[%s1009_s5] sm:$0x1] }
  0x61   :  { %425 = vmatprep.subr.mxu0 %v404_v10 }
  0x62   :  { %426 = vmatpush1.msra.mxu0 %v403_v11  ;;  %v976_v10 = vsub.s32 0, %v366_v8  ;;  %v713_v8 = vld [vmem:[%s1009_s5 + $0x1] sm:$0x1]  ;;  %s839_s5 = scalar_lea.vmem %s677_s14, 256 }
  0x63   :  { %427 = vmatprep.subr.mxu0 %v402_v12  ;;  %p840_p6 = scmp.ne.s32.totalorder %s677_s14, %s839_s5  ;;  %p845_p8 = scmp.lt.s32.totalorder %s839_s5, %s839_s5 }
  0x64   :  { %428 = vmatpush1.msra.mxu0 %v401_v13  ;;  %v361_v13 = vld [vmem:[%s1010_s6] sm:$0x1] }
  0x65   :  { %429 = vmatprep.subr.mxu0 %v400_v14  ;;  %p846_p9 = por %p845_p8, %p844_p7 }
  0x66   :  { %430 = vmatpush1.msra.mxu0 %v399_v15 }
  0x67   :  { %431 = vmatprep.subr.mxu0 %v398_v16  ;;  %p847_p10 = pnand %p846_p9, %p840_p6 }
  0x68   :  { %432 = vmatpush1.msra.mxu0 %v397_v17 }
  0x69   :  { %433 = vmatprep.subr.mxu0 %v396_v18 }
  0x6a   :  { %434 = vmatpush1.msra.mxu0 %v395_v19 }
  0x6b   :  { %435 = vmatprep.subr.mxu0 %v394_v20 }
  0x6c   :  { %436 = vmatpush1.msra.mxu0 %v393_v21 }
  0x6d   :  { %437 = vmatprep.subr.mxu0 %v392_v22 }
  0x6e   :  { %438 = vmatpush1.msra.mxu0 %v391_v23 }
  0x6f   :  { %439 = vmatprep.subr.mxu0 %v390_v24  ;;  %v745_v24 = vld [vmem:[#allocation8 + $0x40] sm:$0xff]  }
  0x70   :  { %440 = vmatpush1.msra.mxu0 %v389_v25 }
  0x71   :  { %441 = vmatprep.subr.mxu0 %v388_v26 }
  0x72   :  { %442 = vmatpush1.msra.mxu0 %v387_v27 }
  0x73   :  { %443 = vmatprep.subr.mxu0 %v386_v28 }
  0x74   :  { %444 = vmatpush1.msra.mxu0 %v385_v29  ;;  %v746_v29 = vld [vmem:[#allocation8 + $0x78] sm:$0xff]  }
  0x75   :  { %445 = vmatprep.subr.mxu0 %v384_v30 }
  0x76   :  { %446 = vmatpush1.msra.mxu0 %v383_v31 }
 0x117   :  { %v185_v44 = vpop.f32.mrf.mxu0 }
 0x119   :  { %v187_v45 = vpop.f32.mrf.mxu0 }
 0x11b   :  { %v191_v46 = vpop.f32.mrf.mxu0 }
 0x11c   :  { %v196_v47 = vpack.c.bf16 %v191_v46, %v185_v44 }
 0x11d   :  { %v193_v55 = vpop.f32.mrf.mxu0 }
 0x11e   :  { %289 = vmatpush1.bf16.msra.mxu1 %v196_v47 }
 0x11f   :  { %304 = vmatprep.subr.bf16.mxu1 %v878_v1 }
 0x122   :  { %305 = vmatpush2.bf16.msra.mxu1 %v735_v48 }
 0x123   :  { %558 = vmatprep.subr.bf16.mxu1 %v878_v1 }
 0x125   :  { %307 = vmatmul.mubr.bf16.vlgmr.msra.gmra.mxu1 %v950_v49 }
 0x126   :  { %710 = vmatprep.mubr.msk.bf16.mxu1 %vm270_vm0, %v738_v43  ;;  %559 = vmatpush1.bf16.msra.mxu1 %v739_v32 }
 0x127   :  { %560 = vmatprep.subr.bf16.mxu1 %v878_v1 }
 0x12a   :  { %561 = vmatpush1.bf16.msra.mxu1 %v740_v33 }
 0x12b   :  { %562 = vmatprep.subr.bf16.mxu1 %v878_v1 }
 0x12e   :  { %563 = vmatpush1.bf16.msra.mxu1 %v741_v34 }
 0x12f   :  { %564 = vmatprep.subr.bf16.mxu1 %v878_v1 }
 0x132   :  { %565 = vmatpush1.bf16.msra.mxu1 %v742_v35 }
 0x133   :  { %566 = vmatprep.subr.bf16.mxu1 %v878_v1 }
 0x136   :  { %567 = vmatpush1.bf16.msra.mxu1 %v743_v36 }
 0x137   :  { %568 = vmatprep.subr.bf16.mxu1 %v878_v1 }
 0x13a   :  { %569 = vmatpush1.bf16.msra.mxu1 %v744_v37 }
 0x13b   :  { %570 = vmatprep.subr.bf16.mxu1 %v878_v1 }
 0x13e   :  { %571 = vmatpush1.bf16.msra.mxu1 %v745_v24 }
 0x13f   :  { %572 = vmatprep.subr.bf16.mxu1 %v878_v1 }
 0x1e5   :  { %v308_v50 = vpop.f32.mrf.mxu1 }
 0x1e6   :  { %v309_v52 = vadd.f32 %v308_v50, %v187_v45 }
 0x1e7   :  { %v310_v53 = vpop.f32.mrf.mxu1 }
 0x1e8   :  { %v957_v54 = vadd.f32 %v701_v51, %v309_v52 }
 0x1e9   :  { %v311_v56 = vpop.f32.mrf.mxu1 }
 0x1ea   :  { %v312_v57 = vadd.f32 %v311_v56, %v193_v55  ;;  %v324_v58 = vmul.f32 %v957_v54, %v957_v54 }
 0x1eb   :  { %v313_v59 = vpop.f32.mrf.mxu1 }
 0x1ec   :  { %v961_v60 = vadd.f32 %v701_v51, %v312_v57  ;;  %326 = vadd.xlane.f32.xlu0 %v324_v58 }
 0x1ee   :  { %v325_v61 = vmul.f32 %v961_v60, %v961_v60 }
 0x1f0   :  { %328 = vadd.xlane.f32.xlu0 %v325_v61 }
 0x275   :  { %v327_v38 = vpop.xlane.xlu0 %326 }
 0x276   :  { %v330_v39 = vmax.f32 %v327_v38, 1e-24 }
 0x278   :  { %747 = vrsqrt.f32 %v330_v39 }
 0x279   :  { %v329_v40 = vpop.xlane.xlu0 %328 }
 0x27a   :  { %v331_v41 = vmax.f32 %v329_v40, 1e-24 }
 0x27c   :  { %749 = vrsqrt.f32 %v331_v41 }
 0x285   :  { %v748_v42 = vpop.eup %747 }
 0x286   :  { %v334_v43 = vmul.f32 %v748_v42, %v957_v54 }
 0x288   :  { %v343_v46 = vmul.f32 %v334_v43, %v334_v43 }
 0x289   :  { %v750_v44 = vpop.eup %749 }
 0x28a   :  { %v335_v45 = vmul.f32 %v750_v44, %v961_v60 }
 0x28c   :  { %v336_v47 = vadd.f32 %v335_v45, %v334_v43  ;;  %v344_v48 = vmul.f32 %v335_v45, %v335_v45 }
 0x28e   :  { %v337_v50 = vrot.slane %v336_v47, 4  ;;  %v345_v51 = vadd.f32 %v344_v48, %v343_v46 }
 0x290   :  { %v338_v52 = vadd.f32 %v337_v50, %v336_v47  ;;  %v346_v53 = vrot.slane %v345_v51, 4 }
 0x292   :  { %v339_v55 = vrot.slane %v338_v52, 2  ;;  %v347_v56 = vadd.f32 %v346_v53, %v345_v51 }
 0x294   :  { %v340_v57 = vadd.f32 %v339_v55, %v338_v52  ;;  %v348_v58 = vrot.slane %v347_v56, 2 }
 0x296   :  { %v349_v59 = vadd.f32 %v348_v58, %v347_v56  ;;  %v341_v61 = vrot.slane %v340_v57, 1 }
 0x298   :  { %v350_v62 = vrot.slane %v349_v59, 1  ;;  %v342_v63 = vadd.f32 %v341_v61, %v340_v57 }
 0x29a   :  { %v351_v2 = vadd.f32 %v350_v62, %v349_v59  ;;  %v352_v54 = vmul.f32 0.0625, %v342_v63 }
 0x29c   :  { %v353_v3 = vmul.f32 0.0625, %v351_v2  ;;  %v354_v4 = vmul.f32 %v352_v54, %v352_v54 }
 0x29e   :  { %v355_v60 = vsub.f32 %v353_v3, %v354_v4 }
 0x2a0   :  { %v356_v5 = vmax.f32 %v355_v60, 0.0 }
 0x2a2   :  { %v358_v6 = vadd.f32 1e-05, %v356_v5 }
 0x2a4   :  { %751 = vrsqrt.f32 %v358_v6 }
 0x2b1   :  { %v752_v11 = vpop.eup %751 }
 0x2b2   :  { %v360_v12 = vmul.f32 %v752_v11, %v357_v9 }
 0x2b4   :  { %v362_v14 = vmul.f32 %v360_v12, %v352_v54  ;;  %v368_v15 = vrot.slane %v360_v12, %v976_v10  ;;  %v714_v12 = vld [vmem:[%s1010_s6 + $0x1] sm:$0x1] }
 0x2b6   :  { %v363_v16 = vsub.f32 %v361_v13, %v362_v14  ;;  %v370_v17 = vmul.f32 %v368_v15, %v334_v43  ;;  %v371_v20 = vmul.f32 %v368_v15, %v335_v45 }
 0x2b8   :  { %v376_v18 = vrot.slane %v363_v16, %v976_v10 }
 0x2ba   :  { %v378_v19 = vadd.f32 %v376_v18, %v370_v17  ;;  %v379_v22 = vadd.f32 %v376_v18, %v371_v20 }
 0x2bc   :  { %v380_v21 = vmax.f32 %v378_v19, 0.0  ;;  %v381_v23 = vmax.f32 %v379_v22, 0.0 }
 0x2be   :  { %480 = vmatmul.mubr.f32.vlgmr.msra.gmra.mxu0 %v380_v21 }
 0x2bf   :  { %485 = vmatprep.mubr.f32.mxu0 %v877_v0  ;;  %v712_v0 = vld [vmem:[%s1008_s4 + $0x1] ss:$0 sm:$0xff] }
 0x2c2   :  { %486 = vmatmul.mubr.f32.gmra.mxu0 %v381_v23 }
 0x37e   :  { %v481_v25 = vpop.f32.mrf.mxu0 }
 0x380   :  { %v483_v26 = vpop.f32.mrf.mxu0 }
 0x382   :  { %v487_v27 = vpop.f32.mrf.mxu0 }
 0x383   :  { %v492_v28 = vpack.c.bf16 %v487_v27, %v481_v25 }
 0x384   :  { %v489_v34 = vpop.f32.mrf.mxu0 }
 0x385   :  { %573 = vmatpush1.bf16.msra.mxu1 %v492_v28 }
 0x386   :  { %588 = vmatprep.subr.bf16.mxu1 %v878_v1 }
 0x389   :  { %589 = vmatpush2.bf16.msra.mxu1 %v746_v29 }
 0x38c   :  { %591 = vmatmul.mubr.bf16.vlgmr.msra.gmra.mxu1 %v950_v49 }
 0x44c   :  { %v592_v30 = vpop.f32.mrf.mxu1 }
 0x44d   :  { %v593_v31 = vadd.f32 %v592_v30, %v483_v26 }
 0x44e   :  { %v594_v32 = vpop.f32.mrf.mxu1 }
 0x44f   :  { %v607_v33 = vadd.f32 %v712_v0, %v593_v31 }
 0x450   :  { %v595_v35 = vpop.f32.mrf.mxu1 }
 0x451   :  { %v596_v36 = vadd.f32 %v595_v35, %v489_v34  ;;  %v609_v37 = vmul.f32 %v607_v33, %v607_v33 }
 0x452   :  { %v597_v38 = vpop.f32.mrf.mxu1 }
 0x453   :  { %v608_v39 = vadd.f32 %v712_v0, %v596_v36  ;;  %611 = vadd.xlane.f32.xlu1 %v609_v37 }
 0x455   :  { %v610_v40 = vmul.f32 %v608_v39, %v608_v39 }
 0x457   :  { %613 = vadd.xlane.f32.xlu1 %v610_v40 }
 0x4dc   :  { %v612_v1 = vpop.xlane.xlu1 %611 }
 0x4dd   :  { %v615_v41 = vmax.f32 %v612_v1, 1e-24 }
 0x4df   :  { %753 = vrsqrt.f32 %v615_v41 }
 0x4e0   :  { %v614_v49 = vpop.xlane.xlu1 %613 }
 0x4e1   :  { %v616_v42 = vmax.f32 %v614_v49, 1e-24 }
 0x4e3   :  { %755 = vrsqrt.f32 %v616_v42 }
 0x4ec   :  { %v754_v43 = vpop.eup %753 }
 0x4ed   :  { %v619_v44 = vmul.f32 %v754_v43, %v607_v33 }
 0x4ef   :  { %v628_v48 = vmul.f32 %v619_v44, %v619_v44 }
 0x4f0   :  { %v756_v45 = vpop.eup %755 }
 0x4f1   :  { %v620_v46 = vmul.f32 %v756_v45, %v608_v39 }
 0x4f3   :  { %v621_v47 = vadd.f32 %v620_v46, %v619_v44  ;;  %v629_v50 = vmul.f32 %v620_v46, %v620_v46 }
 0x4f5   :  { %v622_v51 = vrot.slane %v621_v47, 4  ;;  %v630_v52 = vadd.f32 %v629_v50, %v628_v48 }
 0x4f7   :  { %v623_v53 = vadd.f32 %v622_v51, %v621_v47  ;;  %v631_v55 = vrot.slane %v630_v52, 4 }
 0x4f9   :  { %v624_v56 = vrot.slane %v623_v53, 2  ;;  %v632_v57 = vadd.f32 %v631_v55, %v630_v52 }
 0x4fb   :  { %v625_v58 = vadd.f32 %v624_v56, %v623_v53  ;;  %v633_v59 = vrot.slane %v632_v57, 2 }
 0x4fd   :  { %v626_v61 = vrot.slane %v625_v58, 1  ;;  %v634_v62 = vadd.f32 %v633_v59, %v632_v57 }
 0x4ff   :  { %v627_v63 = vadd.f32 %v626_v61, %v625_v58  ;;  %v635_v2 = vrot.slane %v634_v62, 1 }
 0x501   :  { %v636_v54 = vadd.f32 %v635_v2, %v634_v62  ;;  %v637_v3 = vmul.f32 0.0625, %v627_v63 }
 0x503   :  { %v638_v4 = vmul.f32 0.0625, %v636_v54  ;;  %v639_v60 = vmul.f32 %v637_v3, %v637_v3 }
 0x505   :  { %v640_v5 = vsub.f32 %v638_v4, %v639_v60 }
 0x507   :  { %v641_v6 = vmax.f32 %v640_v5, 0.0 }
 0x509   :  { %v644_v7 = vadd.f32 1e-05, %v641_v6 }
 0x50b   :  { %757 = vrsqrt.f32 %v644_v7 }
 0x518   :  { %v758_v9 = vpop.eup %757 }
 0x519   :  { %v646_v11 = vmul.f32 %v758_v9, %v713_v8 }
 0x51b   :  { %v649_v13 = vmul.f32 %v646_v11, %v637_v3  ;;  %v655_v14 = vrot.slane %v646_v11, %v976_v10 }
 0x51d   :  { %v650_v15 = vsub.f32 %v714_v12, %v649_v13  ;;  %v657_v16 = vmul.f32 %v655_v14, %v619_v44  ;;  %v658_v17 = vmul.f32 %v655_v14, %v620_v46 }
 0x51f   :  { %v663_v18 = vrot.slane %v650_v15, %v976_v10 }
 0x521   :  { %v665_v19 = vadd.f32 %v663_v18, %v657_v16  ;;  %v666_v20 = vadd.f32 %v663_v18, %v658_v17 }
 0x523   :  { %v667_v21 = vmax.f32 %v665_v19, 0.0  ;;  %v668_v22 = vmax.f32 %v666_v20, 0.0 }
 0x525   :  { %669 = vst [vmem:[#allocation10] sm:$0xff] %v667_v21  ;;  %670 = vst [vmem:[#allocation10 + $0x8] sm:$0xff] %v668_v22 }
 0x526   :  { %850 = shalt.err (!%p847_p10)
}
 0x527   :  { %682 = dma.vmem_to_hbm [thread:$0]  %s677_s14, 256, %s1011_s7, [#allocation4], %s869_s29, %s869_s29, %s870_s30  }
 0x528   :  { %865 = dma.done.wait [#allocation4], 256  }
 0x529   :  { %866 = vsyncadd [#allocation4], 4294967040 }
 0x52a   :  { %686 = vsyncpa [#allocation3], 1 }
 0x52b   :  { %687 = vsyncpa [#allocation6], 1 }
 0x52c   :  { %688 = vsyncpa [#allocation9], 1 }
 0x52d   :  { %689 = vsyncpa [#allocation4], 1 }

</bundles_post_ra>
